<compile_context>
chip_gen: v7x
topology: tpu7x:2x2x1
jax: 0.10.0
libtpu: 0.0.40
codegen_flags: <defaults>
</compile_context>

<pallas_src>
import jax
import jax.numpy as jnp
from jax.experimental import pallas as pl
from jax.experimental.pallas import tpu as pltpu


def decoder_lstm_kernel(x_ref, hc0_ref, wih4_ref, whh4_ref, b4_ref, wout_ref,
                        bout_ref, y_ref, hc_ref):
    """One grid step == one LSTM time step (grid axis is the recurrence)."""
    t = pl.program_id(0)

    @pl.when(t == 0)
    def _():
        hc_ref[...] = hc0_ref[...]          # load initial (h0, c0) into the carry

    x_t = x_ref[0]                          # (B, 1)  current-step input
    h = hc_ref[0]                           # (B, H)  carried hidden state
    c = hc_ref[1]                           # (B, H)  carried cell state

    # Per-gate weights pre-split in the wrapper -> each gate is a lane-aligned
    # (B, H) tile; no sub-128-lane slicing of a fused 4H block.
    def gate_pre(g):
        return (x_t * wih4_ref[g]           # input_size == 1 -> broadcast scale
                + jnp.dot(h, whh4_ref[g], preferred_element_type=jnp.float32)
                + b4_ref[g])

    i_g = jax.nn.sigmoid(gate_pre(0))       # PyTorch gate order [i, f, g, o]
    f_g = jax.nn.sigmoid(gate_pre(1))
    g_g = jnp.tanh(gate_pre(2))
    o_g = jax.nn.sigmoid(gate_pre(3))

    c1 = f_g * c + i_g * g_g
    h1 = o_g * jnp.tanh(c1)

    hc_ref[0] = h1                          # carry for next step / final output
    hc_ref[1] = c1

    # linear_out: (B,H) -> (B,1) as VPU multiply + lane reduce
    # (avoids a degenerate N=1 matmul on the MXU).
    y_ref[0] = (jnp.sum(h1 * wout_ref[...], axis=-1, keepdims=True)
                + bout_ref[0])


def prepare_decoder_params(params):
    """One-time parameter preprocessing (hoisted out of the per-call path)."""
    H = params["weight_hh"].shape[1]
    f32 = jnp.float32
    # PyTorch packs gates as [i, f, g, o] along dim 0 of the (4H, .) tensors.
    wih4 = jnp.transpose(params["weight_ih"].astype(f32).reshape(4, H, 1),
                         (0, 2, 1))                                    # (4,1,H)
    whh4 = jnp.transpose(params["weight_hh"].astype(f32).reshape(4, H, H),
                         (0, 2, 1))                                    # (4,H,H)
    b4 = (params["bias_ih"] + params["bias_hh"]).astype(f32).reshape(4, 1, H)
    wout = params["linear_w"].astype(f32).reshape(1, H)
    bout = params["linear_b"].astype(f32).reshape(1)
    return {"wih4": wih4, "whh4": whh4, "b4": b4, "wout": wout, "bout": bout}


def decoder_forward(batches, hidden_states, prepped):
    """Pallas equivalent of Decoder.forward.

    batches:       (B, T, 1) float32   (T == 1 for the module's decode step)
    hidden_states: (h0, c0), each (1, B, H)
    prepped:       output of prepare_decoder_params (hoisted, reused per call)
    returns: (out, (h1, c1)) with out (B, 1) for T == 1 (else (B, T, 1)).
    """
    h0, c0 = hidden_states
    B, T, _ = batches.shape
    H = h0.shape[-1]

    x_tm = jnp.transpose(batches.astype(jnp.float32), (1, 0, 2))   # (T, B, 1)
    hc0 = jnp.concatenate([h0, c0], axis=0).astype(jnp.float32)    # (2, B, H)

    y, hc = pl.pallas_call(
        decoder_lstm_kernel,
        grid=(T,),
        in_specs=[
            pl.BlockSpec((1, B, 1), lambda t: (t, 0, 0)),        # x_t (per step)
            pl.BlockSpec((2, B, H), lambda t: (0, 0, 0)),        # (h0, c0), once
            pl.BlockSpec((4, 1, H), lambda t: (0, 0, 0)),        # W_ih per gate
            pl.BlockSpec((4, H, H), lambda t: (0, 0, 0)),        # W_hh^T per gate
            pl.BlockSpec((4, 1, H), lambda t: (0, 0, 0)),        # fused bias
            pl.BlockSpec((1, H), lambda t: (0, 0)),              # linear weight
            pl.BlockSpec((1,), lambda t: (0,),
                         memory_space=pltpu.MemorySpace.SMEM),   # linear bias
        ],
        out_specs=(
            pl.BlockSpec((1, B, 1), lambda t: (t, 0, 0)),        # per-step y_t
            pl.BlockSpec((2, B, H), lambda t: (0, 0, 0)),        # resident (h,c)
        ),
        out_shape=(
            jax.ShapeDtypeStruct((T, B, 1), jnp.float32),
            jax.ShapeDtypeStruct((2, B, H), jnp.float32),
        ),
        compiler_params=pltpu.CompilerParams(
            dimension_semantics=("arbitrary",)),                 # recurrent axis
    )(x_tm, hc0, prepped["wih4"], prepped["whh4"], prepped["b4"],
      prepped["wout"], prepped["bout"])

    h1 = hc[0:1]                            # (1, B, H)
    c1 = hc[1:2]                            # (1, B, H)
    if T == 1:
        out = y.reshape(B, 1)               # lstm_out.squeeze(1) -> Linear
    else:
        out = jnp.transpose(y, (1, 0, 2))   # squeeze(1) is a no-op -> (B, T, 1)
    return out, (h1, c1)
    # TODO(synk): for very large B, add a batch grid axis marked "parallel" so
    # both v7x TensorCores are used; unnecessary at these sizes.


def init_params(key, n_hidden):
    """Deterministic synthetic init (PyTorch-style uniform(-1/sqrt(H), 1/sqrt(H)))."""
    k = 1.0 / jnp.sqrt(jnp.float32(n_hidden))
    keys = jax.random.split(key, 6)
    u = lambda kk, shape: jax.random.uniform(kk, shape, jnp.float32, -k, k)
    return {
        "weight_ih": u(keys[0], (4 * n_hidden, 1)),
        "weight_hh": u(keys[1], (4 * n_hidden, n_hidden)),
        "bias_ih":   u(keys[2], (4 * n_hidden,)),
        "bias_hh":   u(keys[3], (4 * n_hidden,)),
        "linear_w":  u(keys[4], (1, n_hidden)),
        "linear_b":  u(keys[5], (1,)),
    }


def reference_forward(batches, hidden_states, params):
    """Pure-JAX reference matching PyTorch LSTM + Linear semantics (any T)."""
    h0, c0 = hidden_states
    B, T, _ = batches.shape
    H = h0.shape[-1]
    h = h0.reshape(B, H)
    c = c0.reshape(B, H)
    hs = []
    for t in range(T):
        x = batches[:, t, :]                                      # (B, 1)
        gates = (x @ params["weight_ih"].T + h @ params["weight_hh"].T
                 + params["bias_ih"] + params["bias_hh"])
        i = jax.nn.sigmoid(gates[:, 0:H])
        f = jax.nn.sigmoid(gates[:, H:2 * H])
        g = jnp.tanh(gates[:, 2 * H:3 * H])
        o = jax.nn.sigmoid(gates[:, 3 * H:4 * H])
        c = f * c + i * g
        h = o * jnp.tanh(c)
        hs.append(h)
    lstm_out = jnp.stack(hs, axis=1)                              # (B, T, H)
    sq = jnp.squeeze(lstm_out, axis=1) if T == 1 else lstm_out
    out = sq @ params["linear_w"].T + params["linear_b"]
    return out, (h.reshape(1, B, H), c.reshape(1, B, H))


if __name__ == "__main__":
    B = 8            # batch
    H = 32           # n_hidden
    n_features = 4   # stored by the module but unused in forward

    key = jax.random.PRNGKey(0)
    kp, kx, kh, kc, kx2 = jax.random.split(key, 5)

    params = init_params(kp, H)
    prepped = prepare_decoder_params(params)      # hoisted: once per param set

    h0 = jax.random.normal(kh, (1, B, H), jnp.float32)
    c0 = jax.random.normal(kc, (1, B, H), jnp.float32)

    fwd = jax.jit(decoder_forward)

    # --- single decode step (T=1): exactly the module's forward -------------
    batches = jax.random.normal(kx, (B, 1, 1), jnp.float32)
    out, (h1, c1) = fwd(batches, (h0, c0), prepped)
    jax.block_until_ready((out, h1, c1))

    ref_out, (ref_h1, ref_c1) = reference_forward(batches, (h0, c0), params)
    assert jnp.allclose(out, ref_out, atol=1e-5, rtol=1e-5)
    assert jnp.allclose(h1, ref_h1, atol=1e-5, rtol=1e-5)
    assert jnp.allclose(c1, ref_c1, atol=1e-5, rtol=1e-5)

    # --- multi-step sequence (T=8): whole recurrence in ONE pallas_call -----
    T = 8
    batches_seq = jax.random.normal(kx2, (B, T, 1), jnp.float32)
    out_s, (h1_s, c1_s) = fwd(batches_seq, (h0, c0), prepped)
    jax.block_until_ready((out_s, h1_s, c1_s))

    ref_out_s, (ref_h1_s, ref_c1_s) = reference_forward(batches_seq, (h0, c0), params)
    assert jnp.allclose(out_s, ref_out_s, atol=1e-4, rtol=1e-4)
    assert jnp.allclose(h1_s, ref_h1_s, atol=1e-4, rtol=1e-4)
    assert jnp.allclose(c1_s, ref_c1_s, atol=1e-4, rtol=1e-4)

    print("KERNEL_OK")
</pallas_src>

<mosaic_0001>
module attributes {stable_mosaic.version = 11 : i64} {
  func.func @decoder_lstm_kernel(%arg0: i32, %arg1: memref<1x8x1xf32, #tpu.memory_space<vmem>>, %arg2: memref<2x8x32xf32, #tpu.memory_space<vmem>>, %arg3: memref<4x1x32xf32, #tpu.memory_space<vmem>>, %arg4: memref<4x32x32xf32, #tpu.memory_space<vmem>>, %arg5: memref<4x1x32xf32, #tpu.memory_space<vmem>>, %arg6: memref<1x32xf32, #tpu.memory_space<vmem>>, %arg7: memref<1xf32, #tpu.memory_space<smem>>, %arg8: memref<1x8x1xf32, #tpu.memory_space<vmem>>, %arg9: memref<2x8x32xf32, #tpu.memory_space<vmem>>) attributes {dimension_semantics = [#tpu.dimension_semantics<arbitrary>], iteration_bounds = array<i64: 1>, scalar_prefetch = 0 : i64, scratch_operands = 0 : i64, tpu.core_type = #tpu.core_type<tc>, window_params = [{transform_indices = @transform_0, window_bounds = array<i64: 1, 8, 1>}, {pipeline_mode = #tpu.pipeline_mode<synchronous>, transform_indices = @transform_1, window_bounds = array<i64: 2, 8, 32>}, {pipeline_mode = #tpu.pipeline_mode<synchronous>, transform_indices = @transform_2, window_bounds = array<i64: 4, 1, 32>}, {pipeline_mode = #tpu.pipeline_mode<synchronous>, transform_indices = @transform_3, window_bounds = array<i64: 4, 32, 32>}, {pipeline_mode = #tpu.pipeline_mode<synchronous>, transform_indices = @transform_4, window_bounds = array<i64: 4, 1, 32>}, {pipeline_mode = #tpu.pipeline_mode<synchronous>, transform_indices = @transform_5, window_bounds = array<i64: 1, 32>}, {transform_indices = @transform_6, window_bounds = array<i64: 1>}, {transform_indices = @transform_7, window_bounds = array<i64: 1, 8, 1>}, {pipeline_mode = #tpu.pipeline_mode<synchronous>, transform_indices = @transform_8, window_bounds = array<i64: 2, 8, 32>}]} {
    %c0_i32 = arith.constant 0 : i32
    %0 = arith.cmpi eq, %arg0, %c0_i32 : i32
    %1 = arith.extui %0 : i1 to i32
    %c0_i32_0 = arith.constant 0 : i32
    %2 = arith.cmpi ne, %1, %c0_i32_0 : i32
    scf.if %2 {
      %c0_61 = arith.constant 0 : index
      %c0_62 = arith.constant 0 : index
      %c0_63 = arith.constant 0 : index
      %99 = vector.load %arg2[%c0_61, %c0_62, %c0_63] : memref<2x8x32xf32, #tpu.memory_space<vmem>>, vector<2x8x32xf32>
      %c0_64 = arith.constant 0 : index
      %c0_65 = arith.constant 0 : index
      %c0_66 = arith.constant 0 : index
      %100 = vector.load %arg9[%c0_64, %c0_65, %c0_66] : memref<2x8x32xf32, #tpu.memory_space<vmem>>, vector<2x8x32xf32>
      tpu.vector_store %arg9[%c0_64, %c0_65, %c0_66], %99 {strides = array<i32>} : memref<2x8x32xf32, #tpu.memory_space<vmem>>, vector<2x8x32xf32>,
    } else {
    }
    %c0 = arith.constant 0 : index
    %c0_1 = arith.constant 0 : index
    %c0_2 = arith.constant 0 : index
    %3 = vector.load %arg1[%c0, %c0_1, %c0_2] : memref<1x8x1xf32, #tpu.memory_space<vmem>>, vector<1x8x1xf32>
    %4 = vector.shape_cast %3 : vector<1x8x1xf32> to vector<8x1xf32>
    %c0_3 = arith.constant 0 : index
    %c0_4 = arith.constant 0 : index
    %c0_5 = arith.constant 0 : index
    %5 = vector.load %arg9[%c0_3, %c0_4, %c0_5] : memref<2x8x32xf32, #tpu.memory_space<vmem>>, vector<1x8x32xf32>
    %6 = vector.shape_cast %5 : vector<1x8x32xf32> to vector<8x32xf32>
    %c1 = arith.constant 1 : index
    %c0_6 = arith.constant 0 : index
    %c0_7 = arith.constant 0 : index
    %7 = vector.load %arg9[%c1, %c0_6, %c0_7] : memref<2x8x32xf32, #tpu.memory_space<vmem>>, vector<1x8x32xf32>
    %8 = vector.shape_cast %7 : vector<1x8x32xf32> to vector<8x32xf32>
    %c0_8 = arith.constant 0 : index
    %c0_9 = arith.constant 0 : index
    %c0_10 = arith.constant 0 : index
    %9 = vector.load %arg3[%c0_8, %c0_9, %c0_10] : memref<4x1x32xf32, #tpu.memory_space<vmem>>, vector<1x1x32xf32>
    %10 = vector.shape_cast %9 : vector<1x1x32xf32> to vector<1x32xf32>
    %11 = vector.broadcast %4 : vector<8x1xf32> to vector<8x32xf32>
    %12 = vector.broadcast %10 : vector<1x32xf32> to vector<8x32xf32>
    %13 = arith.mulf %11, %12 : vector<8x32xf32>
    %c0_11 = arith.constant 0 : index
    %c0_12 = arith.constant 0 : index
    %c0_13 = arith.constant 0 : index
    %14 = vector.load %arg4[%c0_11, %c0_12, %c0_13] : memref<4x32x32xf32, #tpu.memory_space<vmem>>, vector<1x32x32xf32>
    %15 = vector.shape_cast %14 : vector<1x32x32xf32> to vector<32x32xf32>
    %cst = arith.constant dense<0.000000e+00> : vector<8x32xf32>
    %16 = tpu.matmul %6, %15, %cst {dimension_numbers = #tpu.dot_dimension_numbers<[1], [0], [0], [1], [0, 0, 1, 1], [], []>} : vector<8x32xf32>, vector<32x32xf32>, vector<8x32xf32> -> vector<8x32xf32>
    %17 = arith.addf %13, %16 : vector<8x32xf32>
    %c0_14 = arith.constant 0 : index
    %c0_15 = arith.constant 0 : index
    %c0_16 = arith.constant 0 : index
    %18 = vector.load %arg5[%c0_14, %c0_15, %c0_16] : memref<4x1x32xf32, #tpu.memory_space<vmem>>, vector<1x1x32xf32>
    %19 = vector.shape_cast %18 : vector<1x1x32xf32> to vector<1x32xf32>
    %20 = vector.broadcast %19 : vector<1x32xf32> to vector<8x32xf32>
    %21 = arith.addf %17, %20 : vector<8x32xf32>
    %22 = arith.negf %21 : vector<8x32xf32>
    %23 = math.exp %22 : vector<8x32xf32>
    %cst_17 = arith.constant 1.000000e+00 : f32
    %24 = vector.broadcast %cst_17 : f32 to vector<8x32xf32>
    %25 = arith.addf %24, %23 : vector<8x32xf32>
    %26 = arith.divf %24, %25 : vector<8x32xf32>
    %c1_18 = arith.constant 1 : index
    %c0_19 = arith.constant 0 : index
    %c0_20 = arith.constant 0 : index
    %27 = vector.load %arg3[%c1_18, %c0_19, %c0_20] : memref<4x1x32xf32, #tpu.memory_space<vmem>>, vector<1x1x32xf32>
    %28 = vector.shape_cast %27 : vector<1x1x32xf32> to vector<1x32xf32>
    %29 = vector.broadcast %4 : vector<8x1xf32> to vector<8x32xf32>
    %30 = vector.broadcast %28 : vector<1x32xf32> to vector<8x32xf32>
    %31 = arith.mulf %29, %30 : vector<8x32xf32>
    %c1_21 = arith.constant 1 : index
    %c0_22 = arith.constant 0 : index
    %c0_23 = arith.constant 0 : index
    %32 = vector.load %arg4[%c1_21, %c0_22, %c0_23] : memref<4x32x32xf32, #tpu.memory_space<vmem>>, vector<1x32x32xf32>
    %33 = vector.shape_cast %32 : vector<1x32x32xf32> to vector<32x32xf32>
    %cst_24 = arith.constant dense<0.000000e+00> : vector<8x32xf32>
    %34 = tpu.matmul %6, %33, %cst_24 {dimension_numbers = #tpu.dot_dimension_numbers<[1], [0], [0], [1], [0, 0, 1, 1], [], []>} : vector<8x32xf32>, vector<32x32xf32>, vector<8x32xf32> -> vector<8x32xf32>
    %35 = arith.addf %31, %34 : vector<8x32xf32>
    %c1_25 = arith.constant 1 : index
    %c0_26 = arith.constant 0 : index
    %c0_27 = arith.constant 0 : index
    %36 = vector.load %arg5[%c1_25, %c0_26, %c0_27] : memref<4x1x32xf32, #tpu.memory_space<vmem>>, vector<1x1x32xf32>
    %37 = vector.shape_cast %36 : vector<1x1x32xf32> to vector<1x32xf32>
    %38 = vector.broadcast %37 : vector<1x32xf32> to vector<8x32xf32>
    %39 = arith.addf %35, %38 : vector<8x32xf32>
    %40 = arith.negf %39 : vector<8x32xf32>
    %41 = math.exp %40 : vector<8x32xf32>
    %cst_28 = arith.constant 1.000000e+00 : f32
    %42 = vector.broadcast %cst_28 : f32 to vector<8x32xf32>
    %43 = arith.addf %42, %41 : vector<8x32xf32>
    %44 = arith.divf %42, %43 : vector<8x32xf32>
    %c2 = arith.constant 2 : index
    %c0_29 = arith.constant 0 : index
    %c0_30 = arith.constant 0 : index
    %45 = vector.load %arg3[%c2, %c0_29, %c0_30] : memref<4x1x32xf32, #tpu.memory_space<vmem>>, vector<1x1x32xf32>
    %46 = vector.shape_cast %45 : vector<1x1x32xf32> to vector<1x32xf32>
    %47 = vector.broadcast %4 : vector<8x1xf32> to vector<8x32xf32>
    %48 = vector.broadcast %46 : vector<1x32xf32> to vector<8x32xf32>
    %49 = arith.mulf %47, %48 : vector<8x32xf32>
    %c2_31 = arith.constant 2 : index
    %c0_32 = arith.constant 0 : index
    %c0_33 = arith.constant 0 : index
    %50 = vector.load %arg4[%c2_31, %c0_32, %c0_33] : memref<4x32x32xf32, #tpu.memory_space<vmem>>, vector<1x32x32xf32>
    %51 = vector.shape_cast %50 : vector<1x32x32xf32> to vector<32x32xf32>
    %cst_34 = arith.constant dense<0.000000e+00> : vector<8x32xf32>
    %52 = tpu.matmul %6, %51, %cst_34 {dimension_numbers = #tpu.dot_dimension_numbers<[1], [0], [0], [1], [0, 0, 1, 1], [], []>} : vector<8x32xf32>, vector<32x32xf32>, vector<8x32xf32> -> vector<8x32xf32>
    %53 = arith.addf %49, %52 : vector<8x32xf32>
    %c2_35 = arith.constant 2 : index
    %c0_36 = arith.constant 0 : index
    %c0_37 = arith.constant 0 : index
    %54 = vector.load %arg5[%c2_35, %c0_36, %c0_37] : memref<4x1x32xf32, #tpu.memory_space<vmem>>, vector<1x1x32xf32>
    %55 = vector.shape_cast %54 : vector<1x1x32xf32> to vector<1x32xf32>
    %56 = vector.broadcast %55 : vector<1x32xf32> to vector<8x32xf32>
    %57 = arith.addf %53, %56 : vector<8x32xf32>
    %58 = math.tanh %57 : vector<8x32xf32>
    %c3 = arith.constant 3 : index
    %c0_38 = arith.constant 0 : index
    %c0_39 = arith.constant 0 : index
    %59 = vector.load %arg3[%c3, %c0_38, %c0_39] : memref<4x1x32xf32, #tpu.memory_space<vmem>>, vector<1x1x32xf32>
    %60 = vector.shape_cast %59 : vector<1x1x32xf32> to vector<1x32xf32>
    %61 = vector.broadcast %4 : vector<8x1xf32> to vector<8x32xf32>
    %62 = vector.broadcast %60 : vector<1x32xf32> to vector<8x32xf32>
    %63 = arith.mulf %61, %62 : vector<8x32xf32>
    %c3_40 = arith.constant 3 : index
    %c0_41 = arith.constant 0 : index
    %c0_42 = arith.constant 0 : index
    %64 = vector.load %arg4[%c3_40, %c0_41, %c0_42] : memref<4x32x32xf32, #tpu.memory_space<vmem>>, vector<1x32x32xf32>
    %65 = vector.shape_cast %64 : vector<1x32x32xf32> to vector<32x32xf32>
    %cst_43 = arith.constant dense<0.000000e+00> : vector<8x32xf32>
    %66 = tpu.matmul %6, %65, %cst_43 {dimension_numbers = #tpu.dot_dimension_numbers<[1], [0], [0], [1], [0, 0, 1, 1], [], []>} : vector<8x32xf32>, vector<32x32xf32>, vector<8x32xf32> -> vector<8x32xf32>
    %67 = arith.addf %63, %66 : vector<8x32xf32>
    %c3_44 = arith.constant 3 : index
    %c0_45 = arith.constant 0 : index
    %c0_46 = arith.constant 0 : index
    %68 = vector.load %arg5[%c3_44, %c0_45, %c0_46] : memref<4x1x32xf32, #tpu.memory_space<vmem>>, vector<1x1x32xf32>
    %69 = vector.shape_cast %68 : vector<1x1x32xf32> to vector<1x32xf32>
    %70 = vector.broadcast %69 : vector<1x32xf32> to vector<8x32xf32>
    %71 = arith.addf %67, %70 : vector<8x32xf32>
    %72 = arith.negf %71 : vector<8x32xf32>
    %73 = math.exp %72 : vector<8x32xf32>
    %cst_47 = arith.constant 1.000000e+00 : f32
    %74 = vector.broadcast %cst_47 : f32 to vector<8x32xf32>
    %75 = arith.addf %74, %73 : vector<8x32xf32>
    %76 = arith.divf %74, %75 : vector<8x32xf32>
    %77 = arith.mulf %44, %8 : vector<8x32xf32>
    %78 = arith.mulf %26, %58 : vector<8x32xf32>
    %79 = arith.addf %77, %78 : vector<8x32xf32>
    %80 = math.tanh %79 : vector<8x32xf32>
    %81 = arith.mulf %76, %80 : vector<8x32xf32>
    %c0_48 = arith.constant 0 : index
    %c0_49 = arith.constant 0 : index
    %c0_50 = arith.constant 0 : index
    %82 = vector.load %arg9[%c0_48, %c0_49, %c0_50] : memref<2x8x32xf32, #tpu.memory_space<vmem>>, vector<1x8x32xf32>
    %83 = vector.shape_cast %82 : vector<1x8x32xf32> to vector<8x32xf32>
    %84 = vector.shape_cast %81 : vector<8x32xf32> to vector<1x8x32xf32>
    tpu.vector_store %arg9[%c0_48, %c0_49, %c0_50], %84 {strides = array<i32>} : memref<2x8x32xf32, #tpu.memory_space<vmem>>, vector<1x8x32xf32>,
    %c1_51 = arith.constant 1 : index
    %c0_52 = arith.constant 0 : index
    %c0_53 = arith.constant 0 : index
    %85 = vector.load %arg9[%c1_51, %c0_52, %c0_53] : memref<2x8x32xf32, #tpu.memory_space<vmem>>, vector<1x8x32xf32>
    %86 = vector.shape_cast %85 : vector<1x8x32xf32> to vector<8x32xf32>
    %87 = vector.shape_cast %79 : vector<8x32xf32> to vector<1x8x32xf32>
    tpu.vector_store %arg9[%c1_51, %c0_52, %c0_53], %87 {strides = array<i32>} : memref<2x8x32xf32, #tpu.memory_space<vmem>>, vector<1x8x32xf32>,
    %c0_54 = arith.constant 0 : index
    %c0_55 = arith.constant 0 : index
    %88 = vector.load %arg6[%c0_54, %c0_55] : memref<1x32xf32, #tpu.memory_space<vmem>>, vector<1x32xf32>
    %89 = vector.broadcast %88 : vector<1x32xf32> to vector<8x32xf32>
    %90 = arith.mulf %81, %89 : vector<8x32xf32>
    %cst_56 = arith.constant dense<0.000000e+00> : vector<8xf32>
    %91 = vector.multi_reduction <add>, %90, %cst_56 [1] : vector<8x32xf32> to vector<8xf32>
    %92 = vector.shape_cast %91 : vector<8xf32> to vector<8x1xf32>
    %c0_57 = arith.constant 0 : index
    %93 = memref.load %arg7[%c0_57] : memref<1xf32, #tpu.memory_space<smem>>
    %94 = vector.broadcast %93 : f32 to vector<8x1xf32>
    %95 = arith.addf %92, %94 : vector<8x1xf32>
    %c0_58 = arith.constant 0 : index
    %c0_59 = arith.constant 0 : index
    %c0_60 = arith.constant 0 : index
    %96 = vector.load %arg8[%c0_58, %c0_59, %c0_60] : memref<1x8x1xf32, #tpu.memory_space<vmem>>, vector<1x8x1xf32>
    %97 = vector.shape_cast %96 : vector<1x8x1xf32> to vector<8x1xf32>
    %98 = vector.shape_cast %95 : vector<8x1xf32> to vector<1x8x1xf32>
    tpu.vector_store %arg8[%c0_58, %c0_59, %c0_60], %98 {strides = array<i32>} : memref<1x8x1xf32, #tpu.memory_space<vmem>>, vector<1x8x1xf32>,
    return
  }
  func.func @transform_0(%arg0: i32) -> (i32, i32, i32) {
    %c0_i32 = arith.constant 0 : i32
    %c0_i32_0 = arith.constant 0 : i32
    %c0_i32_1 = arith.constant 0 : i32
    return %arg0, %c0_i32, %c0_i32_0 : i32, i32, i32
  }
  func.func @transform_1(%arg0: i32) -> (i32, i32, i32) {
    %c0_i32 = arith.constant 0 : i32
    %c0_i32_0 = arith.constant 0 : i32
    %c0_i32_1 = arith.constant 0 : i32
    %c0_i32_2 = arith.constant 0 : i32
    return %c0_i32, %c0_i32_0, %c0_i32_1 : i32, i32, i32
  }
  func.func @transform_2(%arg0: i32) -> (i32, i32, i32) {
    %c0_i32 = arith.constant 0 : i32
    %c0_i32_0 = arith.constant 0 : i32
    %c0_i32_1 = arith.constant 0 : i32
    %c0_i32_2 = arith.constant 0 : i32
    return %c0_i32, %c0_i32_0, %c0_i32_1 : i32, i32, i32
  }
  func.func @transform_3(%arg0: i32) -> (i32, i32, i32) {
    %c0_i32 = arith.constant 0 : i32
    %c0_i32_0 = arith.constant 0 : i32
    %c0_i32_1 = arith.constant 0 : i32
    %c0_i32_2 = arith.constant 0 : i32
    return %c0_i32, %c0_i32_0, %c0_i32_1 : i32, i32, i32
  }
  func.func @transform_4(%arg0: i32) -> (i32, i32, i32) {
    %c0_i32 = arith.constant 0 : i32
    %c0_i32_0 = arith.constant 0 : i32
    %c0_i32_1 = arith.constant 0 : i32
    %c0_i32_2 = arith.constant 0 : i32
    return %c0_i32, %c0_i32_0, %c0_i32_1 : i32, i32, i32
  }
  func.func @transform_5(%arg0: i32) -> (i32, i32) {
    %c0_i32 = arith.constant 0 : i32
    %c0_i32_0 = arith.constant 0 : i32
    %c0_i32_1 = arith.constant 0 : i32
    return %c0_i32, %c0_i32_0 : i32, i32
  }
  func.func @transform_6(%arg0: i32) -> i32 {
    %c0_i32 = arith.constant 0 : i32
    %c0_i32_0 = arith.constant 0 : i32
    return %c0_i32 : i32
  }
  func.func @transform_7(%arg0: i32) -> (i32, i32, i32) {
    %c0_i32 = arith.constant 0 : i32
    %c0_i32_0 = arith.constant 0 : i32
    %c0_i32_1 = arith.constant 0 : i32
    return %arg0, %c0_i32, %c0_i32_0 : i32, i32, i32
  }
  func.func @transform_8(%arg0: i32) -> (i32, i32, i32) {
    %c0_i32 = arith.constant 0 : i32
    %c0_i32_0 = arith.constant 0 : i32
    %c0_i32_1 = arith.constant 0 : i32
    %c0_i32_2 = arith.constant 0 : i32
    return %c0_i32, %c0_i32_0, %c0_i32_1 : i32, i32, i32
  }
}

</mosaic_0001>

<bundles_post_ra>
// kernel: decoder_forward.1
= control target key start
LH: loop header
LB: loop body
LE: loop exit
PB: predicated region body
PF: predicated region fallthrough
CT: control target
= control target key end

     0   :  { %15 = vsyncpa [#allocation4], 0  ;;  %s649_s27 = smov [#allocation3]   ;;  %s786_s0 = inlined_call_operand.vmem [shape: f32[1,8,1], index: 0, kind: input, shape index: {}]   ;;  %s787_s1 = inlined_call_operand.vmem [shape: f32[2,8,32], index: 1, kind: input, shape index: {}]   ;;  %s788_s2 = inlined_call_operand.vmem [shape: f32[4,1,32], index: 2, kind: input, shape index: {}]   ;;  %s789_s3 = inlined_call_operand.hbm [shape: f32[4,32,32], index: 3, kind: input, shape index: {}]   ;;  %s790_s4 = inlined_call_operand.vmem [shape: f32[4,1,32], index: 4, kind: input, shape index: {}]   ;;  %s791_s5 = inlined_call_operand.vmem [shape: f32[1,32], index: 5, kind: input, shape index: {}]   ;;  %s792_s6 = inlined_call_operand.<no memory space> [shape: f32[1], index: 6, kind: input, shape index: {}]   ;;  %s793_s7 = inlined_call_operand.vmem [shape: f32[1,8,1], index: 7, kind: output, shape index: {0}]   ;;  %s794_s8 = inlined_call_operand.vmem [shape: f32[2,8,32], index: 8, kind: output, shape index: {1}]  }
   0x1   :  { %s27_s28 = sshll.u32 %s649_s27, 4  ;;  %s625_s9 = scalar_lea.hbm %s789_s3, 2048  ;;  %s28_s28 = int_to_ptr.vmem [resolvable:$true] %s27_s28 }
   0x2   :  { %p626_p0 = scmp.ne.s32.totalorder %s789_s3, %s625_s9  ;;  %p629_p1 = scmp.lt.u32.totalorder %s625_s9, %s789_s3 }
   0x4   :  { %p631_p2 = pnand %p629_p1, %p626_p0 }
   0x6   :  { %634 = shalt.err (!%p631_p2)
}
   0x7   :  { %s635_s14 = scalar_lea.vmem %s28_s28, 2048  ;;  %p640_p4 = scmp.lt.s32.totalorder %s28_s28, %s28_s28 }
   0x8   :  { %p636_p3 = scmp.ne.s32.totalorder %s28_s28, %s635_s14  ;;  %p641_p5 = scmp.lt.s32.totalorder %s635_s14, %s635_s14 }
   0xa   :  { %p642_p6 = por %p641_p5, %p640_p4 }
   0xc   :  { %p643_p7 = pnand %p642_p6, %p636_p3 }
   0xe   :  { %646 = shalt.err (!%p643_p7)
}
   0xf   :  { %s650_s15 = smov 128   ;;  %s651_s16 = smov 8  }
  0x10   :  { %33 = dma.hbm_to_vmem [thread:$0]  %s789_s3, 2048, %s28_s28, [#allocation4], %s650_s15, %s650_s15, %s651_s16  }
  0x11   :  { %647 = dma.done.wait [#allocation4], 2048  }
  0x12   :  { %648 = vsyncadd [#allocation4], 4294965248  ;;  %v652_v0 = vmov 0.0|0.0   ;;  %vm653_vm0 = vmmov 0   ;;  %v654_v1 = vmov 0.0   ;;  %v655_v2 = vmov 0  }
  0x13   :  { %577 = vmatprep.subr.bf16.mxu0 %v652_v0  ;;  %583 = vmatprep.subr.bf16.mxu1 %v652_v0  ;;  %v69_v3 = vld [vmem:[#allocation3] sm:$0xff]  ;;  %v70_v4 = vld [vmem:[#allocation3 + $0x8] sm:$0xff]  ;;  %vm49_vm1 = vcmask 261120   ;;  %v71_v8 = vld [vmem:[#allocation3 + $0x10] sm:$0xff]  ;;  %vm478_vm2 = vcmask 7168  }
  0x14   :  { %541 = vmatprep.mubr.msk.f32.mxu0 %vm653_vm0, %v654_v1  ;;  %552 = vmatprep.mubr.msk.f32.mxu1 %vm653_vm0, %v654_v1  ;;  %v172_v5 = vld [vmem:[#allocation3 + $0x20] sm:$0xff]  ;;  %v578_v6 = vpack.c.bf16 %v70_v4, %v69_v3  ;;  %v173_v7 = vld [vmem:[#allocation3 + $0x28] sm:$0xff]  ;;  %v72_v9 = vld [vmem:[#allocation3 + $0x18] sm:$0xff] }
  0x15   :  { %608 = vset.pattern.permute.xlu0 %v655_v2  ;;  %v584_v10 = vpack.c.bf16 %v173_v7, %v172_v5  ;;  %v174_v11 = vld [vmem:[#allocation3 + $0x30] sm:$0xff]  ;;  %v175_v12 = vld [vmem:[#allocation3 + $0x38] sm:$0xff]  ;;  %v47_v13 = vld [vmem:[%s787_s1] sm:$0xff]  ;;  %v581_v14 = vpack.c.bf16 %v72_v9, %v71_v8 }
  0x16   :  { %579 = vmatpush3.bf16.msra.mxu0 %v578_v6  ;;  %v48_v15 = vld [vmem:[%s787_s1 + $0x8] sm:$0xff]  ;;  %50 = vst.msk [vmem:[%s794_s8] sm:$0xff] %vm49_vm1, %v47_v13  ;;  %v587_v16 = vpack.c.bf16 %v175_v12, %v174_v11  ;;  %v272_v17 = vld [vmem:[#allocation3 + $0x40] sm:$0xff]  ;;  %v274_v24 = vld [vmem:[#allocation3 + $0x50] sm:$0xff] }
  0x17   :  { %585 = vmatpush3.bf16.msra.mxu1 %v584_v10  ;;  %580 = vmatprep.subr.bf16.mxu0 %v652_v0  ;;  %51 = vst.msk [vmem:[%s794_s8 + $0x8] sm:$0xff] %vm49_vm1, %v48_v15  ;;  %v273_v18 = vld [vmem:[#allocation3 + $0x48] sm:$0xff]  ;;  %v367_v19 = vld [vmem:[#allocation3 + $0x60] sm:$0xff]  ;;  %v275_v25 = vld [vmem:[#allocation3 + $0x58] sm:$0xff] }
  0x18   :  { %586 = vmatprep.subr.bf16.mxu1 %v652_v0  ;;  %v368_v20 = vld [vmem:[#allocation3 + $0x68] sm:$0xff]  ;;  %v52_v21 = vld [vmem:[%s786_s0] sm:$0xff]  ;;  %v590_v22 = vpack.c.bf16 %v273_v18, %v272_v17  ;;  %v369_v26 = vld [vmem:[#allocation3 + $0x70] sm:$0xff]  ;;  %v593_v29 = vpack.c.bf16 %v275_v25, %v274_v24  ;;  %v476_v18 = vstv %s792_s6 }
  0x19   :  { %59 = vperm.xlu0 %608, %v52_v21   ;;  %v596_v23 = vpack.c.bf16 %v368_v20, %v367_v19  ;;  %v370_v27 = vld [vmem:[#allocation3 + $0x78] sm:$0xff]  ;;  %v490_v32 = vld [vmem:[%s788_s2] ss:$0 sm:$0xff]  ;;  %v495_v33 = vld [vmem:[%s788_s2 + $0x1] ss:$0 sm:$0xff] }
  0x1a   :  { %582 = vmatpush3.bf16.msra.mxu0 %v581_v14  ;;  %v599_v30 = vpack.c.bf16 %v370_v27, %v369_v26  ;;  %v492_v37 = vld [vmem:[%s790_s4] ss:$0 sm:$0xff]  ;;  %v498_v39 = vld [vmem:[%s790_s4 + $0x1] ss:$0 sm:$0xff]  ;;  %v506_v46 = vld [vmem:[%s788_s2 + $0x3] ss:$0 sm:$0xff] }
  0x1b   :  { %588 = vmatpush3.bf16.msra.mxu1 %v587_v16  ;;  %589 = vmatprep.subr.bf16.mxu0 %v652_v0  ;;  %v501_v49 = vld [vmem:[%s788_s2 + $0x2] ss:$0 sm:$0xff]  ;;  %v509_v53 = vld [vmem:[%s790_s4 + $0x3] ss:$0 sm:$0xff]  ;;  %v512_v14 = vld [vmem:[%s791_s5] ss:$0 sm:$0xff] }
  0x1c   :  { %595 = vmatprep.subr.bf16.mxu1 %v652_v0  ;;  %v504_v60 = vld [vmem:[%s790_s4 + $0x2] ss:$0 sm:$0xff] }
  0x1d   :  { %v53_v28 = vld [vmem:[%s794_s8] sm:$0xff] }
  0x1e   :  { %542 = vmatmul.mubr.msk.f32.vlgmr.msra.gmra.mrb[0].mxu0 %vm49_vm1, %v53_v28  ;;  %553 = vmatmul.mubr.msk.f32.vlgmr.msra.gmra.mrb[0].mxu1 %vm49_vm1, %v53_v28  ;;  %v489_v5 = vld [vmem:[%s794_s8 + $0x8] sm:$0xff] }
  0x1f   :  { %591 = vmatpush3.bf16.msra.mxu0 %v590_v22  ;;  %597 = vmatpush3.bf16.msra.mxu1 %v596_v23 }
  0x20   :  { %592 = vmatprep.subr.bf16.mxu0 %v652_v0  ;;  %598 = vmatprep.subr.bf16.mxu1 %v652_v0 }
  0x21   :  { %563 = vmatprep.mubr.msk.f32.mxu0 %vm653_vm0, %v654_v1  ;;  %574 = vmatprep.mubr.msk.f32.mxu1 %vm653_vm0, %v654_v1 }
  0x23   :  { %594 = vmatpush3.bf16.msra.mxu0 %v593_v29  ;;  %600 = vmatpush3.bf16.msra.mxu1 %v599_v30 }
  0x26   :  { %564 = vmatmul.mubr.msk.f32.vlgmr.msra.gmra.mrb[2].mxu0 %vm49_vm1, %v53_v28  ;;  %575 = vmatmul.mubr.msk.f32.vlgmr.msra.gmra.mrb[2].mxu1 %vm49_vm1, %v53_v28 }
  0x98   :  { %v60_v31 = vpop.permute.xlu0 %59 }
  0x99   :  { %v68_v34 = vmul.f32 %v490_v32, %v60_v31  ;;  %v170_v35 = vmul.f32 %v495_v33, %v60_v31  ;;  %v365_v50 = vmul.f32 %v506_v46, %v60_v31  ;;  %v270_v54 = vmul.f32 %v501_v49, %v60_v31 }
  0xf1   :  { %v143_v36 = vpop.f32.mrb[0].mxu0  ;;  %v242_v38 = vpop.f32.mrb[0].mxu1 }
  0xf2   :  { %v147_v40 = vadd.f32 %v143_v36, %v68_v34  ;;  %v246_v41 = vadd.f32 %v242_v38, %v170_v35  ;;  %v543_v42 = vpop.f32.mrb[1].mxu0  ;;  %v554_v43 = vpop.f32.mrb[1].mxu1 }
  0xf4   :  { %v155_v44 = vadd.f32 %v492_v37, %v147_v40  ;;  %v255_v45 = vadd.f32 %v498_v39, %v246_v41 }
  0xf6   :  { %v493_v47 = vmul.f32 -1.442695, %v155_v44  ;;  %v499_v48 = vmul.f32 -1.442695, %v255_v45 }
  0xf8   :  { %609 = vpow2.f32 %v493_v47 }
  0xf9   :  { %611 = vpow2.f32 %v499_v48  ;;  %v342_v51 = vpop.f32.mrb[2].mxu0  ;;  %v437_v52 = vpop.f32.mrb[2].mxu1 }
  0xfa   :  { %v441_v55 = vadd.f32 %v437_v52, %v365_v50  ;;  %v565_v56 = vpop.f32.mrb[3].mxu0  ;;  %v576_v57 = vpop.f32.mrb[3].mxu1  ;;  %v346_v58 = vadd.f32 %v342_v51, %v270_v54 }
  0xfc   :  { %v450_v59 = vadd.f32 %v509_v53, %v441_v55  ;;  %v355_v62 = vadd.f32 %v504_v60, %v346_v58 }
  0xfe   :  { %v510_v61 = vmul.f32 -1.442695, %v450_v59 }
 0x100   :  { %613 = vpow2.f32 %v510_v61 }
 0x101   :  { %615 = vtanh.f32 %v355_v62 }
 0x102   :  { %v610_v63 = vpop.eup %609 }
 0x103   :  { %v612_v0 = vpop.eup %611  ;;  %v159_v1 = vadd.f32 1.0, %v610_v63 }
 0x104   :  { %v259_v2 = vadd.f32 1.0, %v612_v0 }
 0x105   :  { %617 = vrcp.f32 %v159_v1 }
 0x106   :  { %619 = vrcp.f32 %v259_v2 }
 0x10a   :  { %v614_v3 = vpop.eup %613 }
 0x10b   :  { %v616_v4 = vpop.eup %615  ;;  %v454_v9 = vadd.f32 1.0, %v614_v3 }
 0x10d   :  { %621 = vrcp.f32 %v454_v9 }
 0x10f   :  { %v618_v6 = vpop.eup %617 }
 0x110   :  { %v620_v7 = vpop.eup %619  ;;  %v458_v8 = vmul.f32 %v618_v6, %v616_v4 }
 0x111   :  { %v457_v10 = vmul.f32 %v620_v7, %v489_v5 }
 0x113   :  { %v459_v11 = vadd.f32 %v458_v8, %v457_v10 }
 0x115   :  { %511 = vst.msk [vmem:[%s794_s8 + $0x8] sm:$0xff] %vm49_vm1, %v459_v11  ;;  %623 = vtanh.f32 %v459_v11 }
 0x117   :  { %v622_v12 = vpop.eup %621 }
 0x11f   :  { %v624_v13 = vpop.eup %623 }
 0x120   :  { %v461_v15 = vmul.f32 %v624_v13, %v622_v12 }
 0x122   :  { %v471_v16 = vmul.f32 %v512_v14, %v461_v15  ;;  %462 = vst.msk [vmem:[%s794_s8] sm:$0xff] %vm49_vm1, %v461_v15 }
 0x124   :  { %v472_v17 = vsel %vm49_vm1, %v471_v16, 0.0 }
 0x125   :  { %473 = vadd.xlane.f32.xlu0 %v472_v17 }
 0x1b2   :  { %v474_v19 = vpop.xlane.xlu0 %473 }
 0x1b3   :  { %v477_v20 = vadd.f32 %v476_v18, %v474_v19 }
 0x1b5   :  { %479 = vst.msk [vmem:[%s793_s7] sm:$0xff] %vm478_vm2, %v477_v20 }
 0x1b6   :  { %488 = vsyncpa [#allocation4], 1 }

</bundles_post_ra>
